<compile_context>
chip_gen: v5e
topology: v5e:2x2
jax: 0.10.0
libtpu: 0.0.40
codegen_flags: <defaults>
</compile_context>

<pallas_src>
import math

import jax
import jax.numpy as jnp
from jax.experimental import pallas as pl
from jax.experimental.pallas import tpu as pltpu

_F32 = jnp.float32
_VMEM = pltpu.MemorySpace.VMEM
_LANES = 128


def _vspec():
    # Whole array resident in VMEM (block_shape == full array -> no (8,128) constraint).
    return pl.BlockSpec(memory_space=_VMEM)


# ----------------------------------------------------------------------------
# Fused decoder kernel: all layers + output projection in one pallas_call
# ----------------------------------------------------------------------------
def _make_fused_decoder_kernel(flavor, num_layers, hidden_size):
    H = hidden_size
    has_c = flavor == "lstm"
    ppl_ = 4 if flavor == "gru" else 3   # params per layer

    def kernel(*refs):
        n_state = 3 if has_c else 2                 # x, h0, (c0)
        n_in = n_state + ppl_ * num_layers + 2      # + per-layer params + w_out, b_out
        in_refs = refs[:n_in]
        out_refs = refs[n_in:]

        x_ref = in_refs[0]
        h0_ref = in_refs[1]
        c0_ref = in_refs[2] if has_c else None
        layer_params = in_refs[n_state:n_state + ppl_ * num_layers]
        w_out_ref = in_refs[n_in - 2]
        b_out_ref = in_refs[n_in - 1]

        if has_c:
            out_ref, h_out_ref, c_out_ref = out_refs
        else:
            out_ref, h_out_ref = out_refs

        layer_in = x_ref[...]
        for l in range(num_layers):              # static unroll; all state stays in VMEM
            p = layer_params[ppl_ * l:ppl_ * (l + 1)]
            h_prev = h0_ref[l]

            if flavor == "rnn":
                wih_ref, whh_ref, b_ref = p
                pre = (jnp.dot(layer_in, wih_ref[...],
                               preferred_element_type=jnp.float32)
                       + jnp.dot(h_prev, whh_ref[...],
                                 preferred_element_type=jnp.float32)
                       + b_ref[...])
                h_new = jnp.tanh(pre)

            elif flavor == "gru":
                wih_ref, whh_ref, bih_ref, bhh_ref = p
                gi = jnp.dot(layer_in, wih_ref[...],
                             preferred_element_type=jnp.float32) + bih_ref[...]
                gh = jnp.dot(h_prev, whh_ref[...],
                             preferred_element_type=jnp.float32) + bhh_ref[...]
                # PyTorch GRU gate order: r, z, n
                r = jax.nn.sigmoid(gi[:, 0:H] + gh[:, 0:H])
                z = jax.nn.sigmoid(gi[:, H:2 * H] + gh[:, H:2 * H])
                n = jnp.tanh(gi[:, 2 * H:3 * H] + r * gh[:, 2 * H:3 * H])
                h_new = (1.0 - z) * n + z * h_prev

            else:  # lstm
                wih_ref, whh_ref, b_ref = p
                c_prev = c0_ref[l]
                gates = (jnp.dot(layer_in, wih_ref[...],
                                 preferred_element_type=jnp.float32)
                         + jnp.dot(h_prev, whh_ref[...],
                                   preferred_element_type=jnp.float32)
                         + b_ref[...])
                # PyTorch LSTM gate order: i, f, g, o
                i = jax.nn.sigmoid(gates[:, 0:H])
                f = jax.nn.sigmoid(gates[:, H:2 * H])
                g = jnp.tanh(gates[:, 2 * H:3 * H])
                o = jax.nn.sigmoid(gates[:, 3 * H:4 * H])
                c_new = f * c_prev + i * g
                h_new = o * jnp.tanh(c_new)
                c_out_ref[l] = c_new

            h_out_ref[l] = h_new
            layer_in = h_new

        # Output projection into a lane-dense (B, 128*k) padded buffer.
        out_ref[...] = (jnp.dot(layer_in, w_out_ref[...],
                                preferred_element_type=jnp.float32)
                        + b_out_ref[...])

    return kernel


# ----------------------------------------------------------------------------
# Decoder module (deterministic synthetic parameters)
# ----------------------------------------------------------------------------
class PallasDecoder:
    def __init__(self, input_size, hidden_size, num_layers, flavor, key):
        assert flavor in ("rnn", "lstm", "gru")
        self.input_size = input_size
        self.hidden_size = hidden_size
        self.num_layers = num_layers
        self.flavor = flavor

        gate_mult = {"rnn": 1, "gru": 3, "lstm": 4}[flavor]
        k = 1.0 / math.sqrt(hidden_size)

        def u(key, shape):
            return jax.random.uniform(key, shape, _F32, minval=-k, maxval=k)

        # Raw (PyTorch-layout, pre-transposed) params for the reference, and the
        # flattened list of per-layer arrays fed to the fused kernel.
        self.raw_layers = []
        self.kernel_layer_params = []
        for layer in range(num_layers):
            in_dim = input_size if layer == 0 else hidden_size
            key, k1, k2, k3, k4 = jax.random.split(key, 5)
            wih_t = u(k1, (in_dim, gate_mult * hidden_size))      # (in_dim, G*H)
            whh_t = u(k2, (hidden_size, gate_mult * hidden_size))  # (H, G*H)
            bih = u(k3, (1, gate_mult * hidden_size))
            bhh = u(k4, (1, gate_mult * hidden_size))
            self.raw_layers.append((wih_t, whh_t, bih, bhh))
            if flavor == "gru":
                # n-gate needs b_hn inside the r* term -> keep biases separate.
                self.kernel_layer_params.extend([wih_t, whh_t, bih, bhh])
            else:
                self.kernel_layer_params.extend([wih_t, whh_t, bih + bhh])

        key, k1, k2 = jax.random.split(key, 3)
        self.w_out_t = jax.random.uniform(k1, (hidden_size, input_size), _F32,
                                          minval=-k, maxval=k)
        self.b_out = jax.random.uniform(k2, (1, input_size), _F32,
                                        minval=-k, maxval=k)

        # Lane-dense padded output projection (unmasked full-vreg store in kernel).
        self.out_pad = int(pl.cdiv(input_size, _LANES)) * _LANES
        self.w_out_pad = jnp.zeros((hidden_size, self.out_pad), _F32
                                   ).at[:, :input_size].set(self.w_out_t)
        self.b_out_pad = jnp.zeros((1, self.out_pad), _F32
                                   ).at[:, :input_size].set(self.b_out)

        self._kernel = _make_fused_decoder_kernel(flavor, num_layers, hidden_size)

    def __call__(self, x, encoder_hidden):
        """x: (batch, input_size);  encoder_hidden: (L, B, H) or tuple for lstm."""
        B = x.shape[0]
        L, H = self.num_layers, self.hidden_size

        if self.flavor == "lstm":
            h0, c0 = encoder_hidden
            state_args = (x, h0, c0)
        else:
            h0 = encoder_hidden
            state_args = (x, h0)

        args = (*state_args, *self.kernel_layer_params,
                self.w_out_pad, self.b_out_pad)

        out_shapes = [jax.ShapeDtypeStruct((B, self.out_pad), _F32),   # padded out
                      jax.ShapeDtypeStruct((L, B, H), _F32)]           # new h
        if self.flavor == "lstm":
            out_shapes.append(jax.ShapeDtypeStruct((L, B, H), _F32))   # new c

        results = pl.pallas_call(
            self._kernel,
            out_shape=tuple(out_shapes),
            in_specs=[_vspec()] * len(args),
            out_specs=tuple([_vspec()] * len(out_shapes)),
        )(*args)

        out = results[0][:, :self.input_size]
        if self.flavor == "lstm":
            hidden = (results[1], results[2])
        else:
            hidden = results[1]
        return out, hidden

    # Pure-JAX reference of the same math (for correctness checking).
    def reference(self, x, encoder_hidden):
        H = self.hidden_size
        if self.flavor == "lstm":
            h0, c0 = encoder_hidden
        else:
            h0 = encoder_hidden
        layer_in = x
        new_h, new_c = [], []
        for l in range(self.num_layers):
            wih_t, whh_t, bih, bhh = self.raw_layers[l]
            h = h0[l]
            if self.flavor == "rnn":
                h_new = jnp.tanh(layer_in @ wih_t + bih + h @ whh_t + bhh)
            elif self.flavor == "gru":
                gi = layer_in @ wih_t + bih
                gh = h @ whh_t + bhh
                r = jax.nn.sigmoid(gi[:, :H] + gh[:, :H])
                z = jax.nn.sigmoid(gi[:, H:2 * H] + gh[:, H:2 * H])
                n = jnp.tanh(gi[:, 2 * H:] + r * gh[:, 2 * H:])
                h_new = (1 - z) * n + z * h
            else:
                gates = layer_in @ wih_t + bih + h @ whh_t + bhh
                i = jax.nn.sigmoid(gates[:, :H])
                f = jax.nn.sigmoid(gates[:, H:2 * H])
                g = jnp.tanh(gates[:, 2 * H:3 * H])
                o = jax.nn.sigmoid(gates[:, 3 * H:])
                c_new = f * c0[l] + i * g
                h_new = o * jnp.tanh(c_new)
                new_c.append(c_new)
            new_h.append(h_new)
            layer_in = h_new
        out = layer_in @ self.w_out_t + self.b_out
        if self.flavor == "lstm":
            return out, (jnp.stack(new_h), jnp.stack(new_c))
        return out, jnp.stack(new_h)


# ----------------------------------------------------------------------------
if __name__ == "__main__":
    input_size = 4      # number of features
    hidden_size = 32
    num_layers = 2
    batch = 8

    ok = True
    for flavor in ("rnn", "gru", "lstm"):
        key = jax.random.PRNGKey(0)
        key, kp, kx, kh, kc = jax.random.split(key, 5)
        dec = PallasDecoder(input_size, hidden_size, num_layers, flavor, kp)

        x = jax.random.normal(kx, (batch, input_size), _F32)
        h0 = jax.random.normal(kh, (num_layers, batch, hidden_size), _F32)
        if flavor == "lstm":
            c0 = jax.random.normal(kc, (num_layers, batch, hidden_size), _F32)
            enc_hidden = (h0, c0)
        else:
            enc_hidden = h0

        out, hidden = dec(x, enc_hidden)
        out = jax.block_until_ready(out)
        hidden = jax.block_until_ready(hidden)

        out_ref, hidden_ref = dec.reference(x, enc_hidden)
        ok &= bool(jnp.allclose(out, out_ref, atol=1e-5, rtol=1e-5))
        if flavor == "lstm":
            ok &= bool(jnp.allclose(hidden[0], hidden_ref[0], atol=1e-5, rtol=1e-5))
            ok &= bool(jnp.allclose(hidden[1], hidden_ref[1], atol=1e-5, rtol=1e-5))
        else:
            ok &= bool(jnp.allclose(hidden, hidden_ref, atol=1e-5, rtol=1e-5))

    if ok:
        print("KERNEL_OK")
    else:
        print("KERNEL_MISMATCH")
</pallas_src>

<mosaic_0001>
module attributes {stable_mosaic.version = 11 : i64} {
  func.func @kernel(%arg0: memref<8x4xf32, #tpu.memory_space<vmem>>, %arg1: memref<2x8x32xf32, #tpu.memory_space<vmem>>, %arg2: memref<4x32xf32, #tpu.memory_space<vmem>>, %arg3: memref<32x32xf32, #tpu.memory_space<vmem>>, %arg4: memref<1x32xf32, #tpu.memory_space<vmem>>, %arg5: memref<32x32xf32, #tpu.memory_space<vmem>>, %arg6: memref<32x32xf32, #tpu.memory_space<vmem>>, %arg7: memref<1x32xf32, #tpu.memory_space<vmem>>, %arg8: memref<32x128xf32, #tpu.memory_space<vmem>>, %arg9: memref<1x128xf32, #tpu.memory_space<vmem>>, %arg10: memref<8x128xf32, #tpu.memory_space<vmem>>, %arg11: memref<2x8x32xf32, #tpu.memory_space<vmem>>) attributes {dimension_semantics = [], scalar_prefetch = 0 : i64, scratch_operands = 0 : i64, tpu.core_type = #tpu.core_type<tc>} {
    %c0 = arith.constant 0 : index
    %c0_0 = arith.constant 0 : index
    %0 = vector.load %arg0[%c0, %c0_0] : memref<8x4xf32, #tpu.memory_space<vmem>>, vector<8x4xf32>
    %c0_1 = arith.constant 0 : index
    %c0_2 = arith.constant 0 : index
    %c0_3 = arith.constant 0 : index
    %1 = vector.load %arg1[%c0_1, %c0_2, %c0_3] : memref<2x8x32xf32, #tpu.memory_space<vmem>>, vector<1x8x32xf32>
    %2 = vector.shape_cast %1 : vector<1x8x32xf32> to vector<8x32xf32>
    %c0_4 = arith.constant 0 : index
    %c0_5 = arith.constant 0 : index
    %3 = vector.load %arg2[%c0_4, %c0_5] : memref<4x32xf32, #tpu.memory_space<vmem>>, vector<4x32xf32>
    %cst = arith.constant dense<0.000000e+00> : vector<8x32xf32>
    %4 = tpu.matmul %0, %3, %cst {dimension_numbers = #tpu.dot_dimension_numbers<[1], [0], [0], [1], [0, 0, 1, 1], [], []>} : vector<8x4xf32>, vector<4x32xf32>, vector<8x32xf32> -> vector<8x32xf32>
    %c0_6 = arith.constant 0 : index
    %c0_7 = arith.constant 0 : index
    %5 = vector.load %arg3[%c0_6, %c0_7] : memref<32x32xf32, #tpu.memory_space<vmem>>, vector<32x32xf32>
    %cst_8 = arith.constant dense<0.000000e+00> : vector<8x32xf32>
    %6 = tpu.matmul %2, %5, %cst_8 {dimension_numbers = #tpu.dot_dimension_numbers<[1], [0], [0], [1], [0, 0, 1, 1], [], []>} : vector<8x32xf32>, vector<32x32xf32>, vector<8x32xf32> -> vector<8x32xf32>
    %7 = arith.addf %4, %6 : vector<8x32xf32>
    %c0_9 = arith.constant 0 : index
    %c0_10 = arith.constant 0 : index
    %8 = vector.load %arg4[%c0_9, %c0_10] : memref<1x32xf32, #tpu.memory_space<vmem>>, vector<1x32xf32>
    %9 = vector.broadcast %8 : vector<1x32xf32> to vector<8x32xf32>
    %10 = arith.addf %7, %9 : vector<8x32xf32>
    %11 = math.tanh %10 : vector<8x32xf32>
    %c0_11 = arith.constant 0 : index
    %c0_12 = arith.constant 0 : index
    %c0_13 = arith.constant 0 : index
    %12 = vector.load %arg11[%c0_11, %c0_12, %c0_13] : memref<2x8x32xf32, #tpu.memory_space<vmem>>, vector<1x8x32xf32>
    %13 = vector.shape_cast %12 : vector<1x8x32xf32> to vector<8x32xf32>
    %14 = vector.shape_cast %11 : vector<8x32xf32> to vector<1x8x32xf32>
    tpu.vector_store %arg11[%c0_11, %c0_12, %c0_13], %14 {strides = array<i32>} : memref<2x8x32xf32, #tpu.memory_space<vmem>>, vector<1x8x32xf32>,
    %c1 = arith.constant 1 : index
    %c0_14 = arith.constant 0 : index
    %c0_15 = arith.constant 0 : index
    %15 = vector.load %arg1[%c1, %c0_14, %c0_15] : memref<2x8x32xf32, #tpu.memory_space<vmem>>, vector<1x8x32xf32>
    %16 = vector.shape_cast %15 : vector<1x8x32xf32> to vector<8x32xf32>
    %c0_16 = arith.constant 0 : index
    %c0_17 = arith.constant 0 : index
    %17 = vector.load %arg5[%c0_16, %c0_17] : memref<32x32xf32, #tpu.memory_space<vmem>>, vector<32x32xf32>
    %cst_18 = arith.constant dense<0.000000e+00> : vector<8x32xf32>
    %18 = tpu.matmul %11, %17, %cst_18 {dimension_numbers = #tpu.dot_dimension_numbers<[1], [0], [0], [1], [0, 0, 1, 1], [], []>} : vector<8x32xf32>, vector<32x32xf32>, vector<8x32xf32> -> vector<8x32xf32>
    %c0_19 = arith.constant 0 : index
    %c0_20 = arith.constant 0 : index
    %19 = vector.load %arg6[%c0_19, %c0_20] : memref<32x32xf32, #tpu.memory_space<vmem>>, vector<32x32xf32>
    %cst_21 = arith.constant dense<0.000000e+00> : vector<8x32xf32>
    %20 = tpu.matmul %16, %19, %cst_21 {dimension_numbers = #tpu.dot_dimension_numbers<[1], [0], [0], [1], [0, 0, 1, 1], [], []>} : vector<8x32xf32>, vector<32x32xf32>, vector<8x32xf32> -> vector<8x32xf32>
    %21 = arith.addf %18, %20 : vector<8x32xf32>
    %c0_22 = arith.constant 0 : index
    %c0_23 = arith.constant 0 : index
    %22 = vector.load %arg7[%c0_22, %c0_23] : memref<1x32xf32, #tpu.memory_space<vmem>>, vector<1x32xf32>
    %23 = vector.broadcast %22 : vector<1x32xf32> to vector<8x32xf32>
    %24 = arith.addf %21, %23 : vector<8x32xf32>
    %25 = math.tanh %24 : vector<8x32xf32>
    %c1_24 = arith.constant 1 : index
    %c0_25 = arith.constant 0 : index
    %c0_26 = arith.constant 0 : index
    %26 = vector.load %arg11[%c1_24, %c0_25, %c0_26] : memref<2x8x32xf32, #tpu.memory_space<vmem>>, vector<1x8x32xf32>
    %27 = vector.shape_cast %26 : vector<1x8x32xf32> to vector<8x32xf32>
    %28 = vector.shape_cast %25 : vector<8x32xf32> to vector<1x8x32xf32>
    tpu.vector_store %arg11[%c1_24, %c0_25, %c0_26], %28 {strides = array<i32>} : memref<2x8x32xf32, #tpu.memory_space<vmem>>, vector<1x8x32xf32>,
    %c0_27 = arith.constant 0 : index
    %c0_28 = arith.constant 0 : index
    %29 = vector.load %arg8[%c0_27, %c0_28] : memref<32x128xf32, #tpu.memory_space<vmem>>, vector<32x128xf32>
    %cst_29 = arith.constant dense<0.000000e+00> : vector<8x128xf32>
    %30 = tpu.matmul %25, %29, %cst_29 {dimension_numbers = #tpu.dot_dimension_numbers<[1], [0], [0], [1], [0, 0, 1, 1], [], []>} : vector<8x32xf32>, vector<32x128xf32>, vector<8x128xf32> -> vector<8x128xf32>
    %c0_30 = arith.constant 0 : index
    %c0_31 = arith.constant 0 : index
    %31 = vector.load %arg9[%c0_30, %c0_31] : memref<1x128xf32, #tpu.memory_space<vmem>>, vector<1x128xf32>
    %32 = vector.broadcast %31 : vector<1x128xf32> to vector<8x128xf32>
    %33 = arith.addf %30, %32 : vector<8x128xf32>
    %c0_32 = arith.constant 0 : index
    %c0_33 = arith.constant 0 : index
    %34 = vector.load %arg10[%c0_32, %c0_33] : memref<8x128xf32, #tpu.memory_space<vmem>>, vector<8x128xf32>
    tpu.vector_store %arg10[%c0_32, %c0_33], %33 {strides = array<i32>} : memref<8x128xf32, #tpu.memory_space<vmem>>, vector<8x128xf32>,
    return
  }
}

</mosaic_0001>

<bundles_post_ra>
// kernel: tpu_custom_call.1
= control target key start
LH: loop header
LB: loop body
LE: loop exit
PB: predicated region body
PF: predicated region fallthrough
CT: control target
= control target key end

     0   :  { %17 = vsyncpa [#allocation3], 0  ;;  %s645_s0 = inlined_call_operand.vmem [shape: f32[8,4], index: 0, kind: input, shape index: {}]   ;;  %s646_s1 = inlined_call_operand.hbm [shape: f32[2,8,32], index: 1, kind: input, shape index: {}]   ;;  %s647_s2 = inlined_call_operand.vmem [shape: f32[4,32], index: 2, kind: input, shape index: {}]   ;;  %s648_s3 = inlined_call_operand.hbm [shape: f32[32,32], index: 3, kind: input, shape index: {}]   ;;  %s649_s4 = inlined_call_operand.vmem [shape: f32[1,32], index: 4, kind: input, shape index: {}]   ;;  %s650_s5 = inlined_call_operand.hbm [shape: f32[32,32], index: 5, kind: input, shape index: {}]   ;;  %s651_s6 = inlined_call_operand.hbm [shape: f32[32,32], index: 6, kind: input, shape index: {}]   ;;  %s652_s7 = inlined_call_operand.vmem [shape: f32[1,32], index: 7, kind: input, shape index: {}]   ;;  %s653_s8 = inlined_call_operand.hbm [shape: f32[32,128], index: 8, kind: input, shape index: {}]   ;;  %s654_s9 = inlined_call_operand.vmem [shape: f32[1,128], index: 9, kind: input, shape index: {}]   ;;  %s655_s10 = inlined_call_operand.hbm [shape: f32[8,128], index: 10, kind: output, shape index: {0}]   ;;  %s656_s11 = inlined_call_operand.hbm [shape: f32[2,8,32], index: 11, kind: output, shape index: {1}]  }
   0x1   :  { %18 = vsyncpa [#allocation6], 0 }
   0x2   :  { %19 = vsyncpa [#allocation9], 0 }
   0x3   :  { %20 = vsyncpa [#allocation4], 0 }
   0x4   :  { %21 = vsyncpa [#allocation13], 0  ;;  %s43_s19 = sshll.u32 %s648_s3, 4  ;;  %s516_s20 = smov [#allocation5]   ;;  %s44_s19 = int_to_ptr.hbm [resolvable:$true] %s43_s19 }
   0x5   :  { %s45_s21 = sshll.u32 %s516_s20, 4  ;;  %s71_s24 = sshll.u32 %s651_s6, 4  ;;  %s46_s21 = int_to_ptr.vmem [resolvable:$true] %s45_s21  ;;  %s72_s24 = int_to_ptr.hbm [resolvable:$true] %s71_s24 }
   0x6   :  { %s517_s25 = smov 128   ;;  %s518_s26 = smov 8  }
   0x7   :  { %51 = dma.hbm_to_vmem [thread:$0]  %s44_s19, 512, %s46_s21, [#allocation6], %s517_s25, %s517_s25, %s518_s26  }
   0x8   :  { %s519_s27 = smov [#allocation8]   ;;  %s28_s3 = sshll.u32 %s646_s1, 4  ;;  %s29_s3 = int_to_ptr.hbm [resolvable:$true] %s28_s3 }
   0x9   :  { %s73_s28 = sshll.u32 %s519_s27, 4  ;;  %s58_s13 = sshll.u32 %s650_s5, 4  ;;  %s74_s28 = int_to_ptr.vmem [resolvable:$true] %s73_s28  ;;  %s59_s13 = int_to_ptr.hbm [resolvable:$true] %s58_s13 }
   0xa   :  { %79 = dma.hbm_to_vmem [thread:$0]  %s72_s24, 512, %s74_s28, [#allocation9], %s517_s25, %s517_s25, %s518_s26  }
   0xb   :  { %s520_s14 = smov [#allocation2]   ;;  %s521_s16 = smov [#allocation7]  }
   0xc   :  { %s30_s15 = sshll.u32 %s520_s14, 4  ;;  %s60_s1 = sshll.u32 %s521_s16, 4  ;;  %s31_s15 = int_to_ptr.vmem [resolvable:$true] %s30_s15  ;;  %s61_s1 = int_to_ptr.vmem [resolvable:$true] %s60_s1 }
   0xd   :  { %36 = dma.hbm_to_vmem [thread:$0]  %s29_s3, 256, %s31_s15, [#allocation3], %s517_s25, %s517_s25, %s518_s26  }
   0xe   :  { %s86_s19 = sshll.u32 %s653_s8, 4  ;;  %s522_s5 = smov [#allocation10]   ;;  %s87_s19 = int_to_ptr.hbm [resolvable:$true] %s86_s19 }
   0xf   :  { %66 = dma.hbm_to_vmem [thread:$0]  %s59_s13, 512, %s61_s1, [#allocation6], %s517_s25, %s517_s25, %s518_s26  }
  0x10   :  { %s88_s20 = sshll.u32 %s522_s5, 4  ;;  %s89_s20 = int_to_ptr.vmem [resolvable:$true] %s88_s20 }
  0x11   :  { %94 = dma.hbm_to_vmem [thread:$0]  %s87_s19, 512, %s89_s20, [#allocation9], %s517_s25, %s517_s25, %s518_s26  }
  0x12   :  { %506 = dma.done.wait [#allocation3], 256  }
  0x13   :  { %507 = vsyncadd [#allocation3], 4294967040 }
  0x14   :  { %508 = dma.done.wait [#allocation6], 1024  }
  0x15   :  { %509 = vsyncadd [#allocation6], 4294966272 }
  0x16   :  { %510 = dma.done.wait [#allocation9], 1024  }
  0x17   :  { %511 = vsyncadd [#allocation9], 4294966272  ;;  %vm152_vm0 = vcmask 1043456   ;;  %v123_v0 = vld [vmem:[#allocation5 + $0x18] sm:$0xff]  ;;  %v122_v1 = vld [vmem:[#allocation5 + $0x10] sm:$0xff]  ;;  %vm148_vm1 = vcmask 31744  }
  0x18   :  { %140 = vmatpush.msra.mxu0 %v123_v0  ;;  %v121_v2 = vld [vmem:[#allocation5 + $0x8] sm:$0xff]  ;;  %v119_v3 = vld [vmem:[%s647_s2] sm:$0xf]  ;;  %v120_v5 = vld [vmem:[#allocation5] sm:$0xff]  ;;  %vm124_vm2 = vcmask 261120   ;;  %s523_s27 = smov [#allocation12]  }
  0x19   :  { %317 = vmatpush.msk.msra.mxu1 %vm152_vm0, %v119_v3  ;;  %v117_v4 = vld [vmem:[%s645_s0] sm:$0xff]  ;;  %v192_v7 = vld [vmem:[#allocation8 + $0x18] sm:$0xff]  ;;  %v190_v11 = vld [vmem:[#allocation8 + $0x8] sm:$0xff]  ;;  %s294_s28 = sshll.u32 %s523_s27, 4  ;;  %s296_s3 = sshll.u32 %s656_s11, 4  ;;  %s295_s28 = int_to_ptr.vmem [resolvable:$true] %s294_s28  ;;  %s297_s3 = int_to_ptr.hbm [resolvable:$true] %s296_s3 }
  0x1a   :  { %141 = vmatpush.msra.mxu0 %v122_v1  ;;  %318 = vmatmul.msk.f32.vlgmr.msra.gmra.mxu1 %vm148_vm1, %v117_v4  ;;  %v118_v6 = vld [vmem:[#allocation2] sm:$0xff]  ;;  %v188_v8 = vld [vmem:[#allocation7 + $0x18] sm:$0xff]  ;;  %v186_v12 = vld [vmem:[#allocation7 + $0x8] sm:$0xff]  ;;  %s524_s12 = smov [#allocation11]   ;;  %s286_s16 = sshll.u32 %s655_s10, 4  ;;  %s287_s16 = int_to_ptr.hbm [resolvable:$true] %s286_s16 }
  0x1b   :  { %208 = vmatpush.msra.mxu2 %v192_v7  ;;  %231 = vmatpush.msra.mxu3 %v188_v8  ;;  %v191_v9 = vld [vmem:[#allocation8 + $0x10] sm:$0xff]  ;;  %v189_v13 = vld [vmem:[#allocation8] sm:$0xff]  ;;  %v184_v15 = vld [vmem:[#allocation2 + $0x8] sm:$0xff]  ;;  %s284_s13 = sshll.u32 %s524_s12, 4  ;;  %s285_s13 = int_to_ptr.vmem [resolvable:$true] %s284_s13 }
  0x1c   :  { %142 = vmatpush.msra.mxu0 %v121_v2  ;;  %v187_v10 = vld [vmem:[#allocation7 + $0x10] sm:$0xff]  ;;  %v185_v14 = vld [vmem:[#allocation7] sm:$0xff]  ;;  %v250_v22 = vld [vmem:[#allocation10 + $0x18] sm:$0xff] }
  0x1d   :  { %209 = vmatpush.msra.mxu2 %v191_v9  ;;  %232 = vmatpush.msra.mxu3 %v187_v10  ;;  %v331_v17 = vld [vmem:[%s649_s4] ss:$0 sm:$0xff]  ;;  %v248_v24 = vld [vmem:[#allocation10 + $0x8] sm:$0xff]  ;;  %v247_v25 = vld [vmem:[#allocation10] sm:$0xff] }
  0x1e   :  { %143 = vmatpush.msra.mxu0 %v120_v5  ;;  %270 = vmatpush.msrb.mxu1 %v250_v22  ;;  %v249_v23 = vld [vmem:[#allocation10 + $0x10] sm:$0xff] }
  0x1f   :  { %316 = vmatmul.msk.f32.vlgmr.msra.gmra.mxu0 %vm124_vm2, %v118_v6  ;;  %210 = vmatpush.msra.mxu2 %v190_v11  ;;  %v332_v27 = vld [vmem:[%s652_s7] ss:$0 sm:$0xff] }
  0x20   :  { %233 = vmatpush.msra.mxu3 %v186_v12  ;;  %271 = vmatpush.msrb.mxu1 %v249_v23  ;;  %v333_v32 = vld [vmem:[%s654_s9] ss:$0 sm:$0xff] }
  0x21   :  { %211 = vmatpush.msra.mxu2 %v189_v13 }
  0x22   :  { %234 = vmatpush.msra.mxu3 %v185_v14  ;;  %319 = vmatmul.msk.f32.vlgmr.msra.gmra.mxu2 %vm124_vm2, %v184_v15 }
  0x23   :  { %272 = vmatpush.msrb.mxu1 %v248_v24 }
  0x25   :  { %273 = vmatpush.msrb.mxu1 %v247_v25 }
  0x97   :  { %v173_v16 = vpop.f32.mrf.mxu1 }
  0x9c   :  { %v145_v18 = vpop.f32.mrf.mxu0 }
  0x9d   :  { %v174_v19 = vadd.f32 %v173_v16, %v145_v18 }
  0x9f   :  { %v180_v20 = vadd.f32 %v331_v17, %v174_v19 }
  0xa1   :  { %334 = vtanh.f32 %v180_v20 }
  0xa5   :  { %v213_v26 = vpop.f32.mrf.mxu2 }
  0xa7   :  { %v335_v21 = vpop.eup %334 }
  0xa8   :  { %182 = vst.msk [vmem:[#allocation12] sm:$0xff] %vm124_vm2, %v335_v21  ;;  %320 = vmatmul.msk.f32.vlgmr.msra.gmra.mxu3 %vm124_vm2, %v335_v21 }
 0x12b   :  { %v236_v28 = vpop.f32.mrf.mxu3 }
 0x12c   :  { %v237_v29 = vadd.f32 %v236_v28, %v213_v26 }
 0x12e   :  { %v243_v30 = vadd.f32 %v332_v27, %v237_v29 }
 0x130   :  { %336 = vtanh.f32 %v243_v30 }
 0x136   :  { %v337_v31 = vpop.eup %336 }
 0x137   :  { %246 = vst.msk [vmem:[#allocation12 + $0x8] sm:$0xff] %vm124_vm2, %v337_v31  ;;  %321 = vmatmul.msk.f32.vlgmr.msrb.gmra.mxu1 %vm124_vm2, %v337_v31 }
 0x138   :  { %302 = dma.vmem_to_hbm [thread:$0]  %s295_s28, 256, %s297_s3, [#allocation13], %s517_s25, %s517_s25, %s518_s26  }
 0x1b4   :  { %v275_v33 = vpop.f32.mrf.mxu1 }
 0x1b5   :  { %v276_v34 = vadd.f32 %v333_v32, %v275_v33 }
 0x1b7   :  { %278 = vst [vmem:[#allocation11] sm:$0xff] %v276_v34 }
 0x1b8   :  { %289 = dma.vmem_to_hbm [thread:$0]  %s285_s13, 128, %s287_s16, [#allocation4]  }
 0x1b9   :  { %512 = dma.done.wait [#allocation4], 128  }
 0x1ba   :  { %513 = vsyncadd [#allocation4], 4294967168 }
 0x1bb   :  { %514 = dma.done.wait [#allocation13], 256  }
 0x1bc   :  { %515 = vsyncadd [#allocation13], 4294967040 }
 0x1bd   :  { %311 = vsyncpa [#allocation3], 1 }
 0x1be   :  { %312 = vsyncpa [#allocation6], 1 }
 0x1bf   :  { %313 = vsyncpa [#allocation9], 1 }
 0x1c0   :  { %314 = vsyncpa [#allocation4], 1 }
 0x1c1   :  { %315 = vsyncpa [#allocation13], 1 }

</bundles_post_ra>
